<compile_context>
chip_gen: v7x
topology: tpu7x:2x2x1
jax: 0.10.0
libtpu: 0.0.40
codegen_flags: <defaults>
</compile_context>

<pallas_src>
import numpy as np
import jax
import jax.numpy as jnp
from jax import lax
from jax.experimental import pallas as pl
from jax.experimental.pallas import tpu as pltpu


# ------------------------------- helpers ------------------------------------

def _round_up(n, m):
    return ((n + m - 1) // m) * m


def _cdiv(a, b):
    return (a + b - 1) // b


def _vmem_limit_bytes():
    """Per-generation scoped-VMEM budget (don't hard-code the v7x cap on v5e/v6e)."""
    try:
        cap = int(pltpu.get_tpu_info().vmem_capacity_bytes)   # 128 MiB v5e/v6e, 64 MiB v7x
        return int(min(cap * 3 // 4, 96 * 1024 * 1024))       # 96 MiB / 96 MiB / 48 MiB
    except Exception:
        return 48 * 1024 * 1024                               # safe on every generation


# ----------------------------- Pallas kernel --------------------------------

def _make_kernel(sub):
    """Kernel over one (tb, 16) batch-major input block -> (16, tb) feature-major out."""

    def kernel(x_ref, wc_ref, bc_ref, wl_ref, bl_ref,
               w1_ref, b1_ref, w2_ref, b2_ref, out_ref):
        # Weights / biases read once per grid step (hoisted out of the inner loop).
        wc = wc_ref[...]; bc = bc_ref[...]      # (16, 64) bf16, (1, 64) f32  folded conv
        wl = wl_ref[...]; bl = bl_ref[...]      # (64, 16) bf16, (1, 16) f32  latent
        w1 = w1_ref[...]; b1 = b1_ref[...]      # (16, 16) bf16, (1, 16) f32  fc_recover
        w2 = w2_ref[...]; b2 = b2_ref[...]      # (16, 16) bf16 (out,in), (16, 1) f32

        n_sub = out_ref.shape[1] // sub         # static: DMA tile / compute sub-tile

        def body(j, carry):
            off = pl.multiple_of(j * sub, sub)
            xb = x_ref[pl.ds(off, sub), :]                                   # (sub, 16) bf16

            # conv folded to dense == Flatten(ReLU(cnn(x)))   (weight-stationary)
            h = jnp.dot(xb, wc, preferred_element_type=jnp.float32) + bc     # (sub, 64) f32
            h = jnp.maximum(h, 0.0).astype(jnp.bfloat16)
            # latent Linear(64, 16) + ReLU
            h = jnp.dot(h, wl, preferred_element_type=jnp.float32) + bl      # (sub, 16) f32
            h = jnp.maximum(h, 0.0).astype(jnp.bfloat16)
            # fc_recover Linear(16, 16) + ReLU
            h = jnp.dot(h, w1, preferred_element_type=jnp.float32) + b1      # (sub, 16) f32
            h = jnp.maximum(h, 0.0).astype(jnp.bfloat16)
            # fc_recover2 Linear(16, 16), emitted feature-major for a lane-dense store:
            #   o[f, n] = sum_i w2[f, i] * h[n, i]      (NT dot, like Q @ K^T)
            o = lax.dot_general(w2, h, (((1,), (1,)), ((), ())),
                                preferred_element_type=jnp.float32) + b2     # (16, sub) f32
            out_ref[:, pl.ds(off, sub)] = o.astype(out_ref.dtype)
            return carry

        lax.fori_loop(0, n_sub, body, 0)

    return kernel


def autoencoder_forward(x_flat, params, *, block_b=32768, sub_b=1024):
    """Fused AutoEncoder forward.

    x_flat : (B, 16) batch-major flattened (1, 4, 4) samples (the module's native
             layout; HBM reads per block are fully contiguous), ideally already bf16.
    Returns the recovered activations FEATURE-MAJOR, shape (16, B) bf16
    (== recovered.T), so the HBM stores stay lane-dense.
    block_b: batch elements per DMA/pipeline tile (raise to 64-128K on v5e/v6e).
    sub_b  : batch elements per in-kernel compute sub-tile (bounds f32 intermediates).
    """
    B, F = x_flat.shape
    assert F == 16
    if x_flat.dtype != jnp.bfloat16:
        # Producers should hand over bf16 directly; this cast is a convenience only.
        x_flat = x_flat.astype(jnp.bfloat16)

    # Sub-tile sits on the 128-lane axis of the output -> multiple of 128.
    sub = min(_round_up(sub_b, 128), _round_up(B, 128))
    tb = min(max(_round_up(block_b, sub), sub), _round_up(B, sub))
    # Keep >=2 grid steps whenever the batch allows it so the "parallel" batch axis
    # can actually shard across v7x's two TensorCores.
    if _cdiv(B, tb) < 2 and B > 2 * sub:
        tb = _round_up(_cdiv(B, 2), sub)
    grid = (_cdiv(B, tb),)   # partial edge blocks: OOB reads feed only dropped columns.

    wc, bc, wl, bl, w1, b1, w2, b2 = params

    const = lambda shape: pl.BlockSpec(shape, lambda i: (0, 0))   # VMEM-resident weights
    in_specs = [
        pl.BlockSpec((tb, 16), lambda i: (i, 0)),   # x: contiguous HBM rows per block
        const((16, 64)), const((1, 64)),            # folded conv   (in, out)
        const((64, 16)), const((1, 16)),            # latent        (in, out)
        const((16, 16)), const((1, 16)),            # fc_recover    (in, out)
        const((16, 16)), const((16, 1)),            # fc_recover2   (out, in) + col bias
    ]
    out_specs = pl.BlockSpec((16, tb), lambda i: (0, i))           # lane-dense stores

    weight_bytes = sum(int(np.prod(p.shape)) * p.dtype.itemsize for p in params)
    cost = pl.CostEstimate(
        flops=2 * B * (16 * 64 + 64 * 16 + 16 * 16 + 16 * 16),
        transcendentals=0,
        bytes_accessed=2 * B * 16 * 2 + weight_bytes)

    return pl.pallas_call(
        _make_kernel(sub),
        out_shape=jax.ShapeDtypeStruct((16, B), jnp.bfloat16),
        grid=grid,
        in_specs=in_specs,
        out_specs=out_specs,
        compiler_params=pltpu.CompilerParams(
            dimension_semantics=("parallel",),       # megacore sharding on v7x
            vmem_limit_bytes=_vmem_limit_bytes()),   # per-generation budget
        cost_estimate=cost,
    )(x_flat, wc, bc, wl, bl, w1, b1, w2, b2)


# ----------------------- parameter setup (plain JAX) ------------------------

def build_folded_conv(w_conv, b_conv):
    """Fold Conv2d(1,16,k=3,s=1,p=0) on a (1,4,4) input into a dense (in, out) map.

    Returns Wc (16, 64) and bc (1, 64) such that for batch-major x_flat (B, 16) whose
    rows are row-major (1,4,4) samples:
      (x_flat @ Wc + bc)[n, c*4 + oh*2 + ow] == conv(x)[n, c, oh, ow]
    i.e. output columns follow PyTorch's NCHW Flatten order.
    """
    w = np.asarray(w_conv, dtype=np.float32)
    b = np.asarray(b_conv, dtype=np.float32)
    Wc = np.zeros((16, 64), dtype=np.float32)
    bc = np.zeros((1, 64), dtype=np.float32)
    for c_out in range(16):
        for oh in range(2):
            for ow in range(2):
                o = c_out * 4 + oh * 2 + ow
                bc[0, o] = b[c_out]
                for kh in range(3):
                    for kw in range(3):
                        i = (oh + kh) * 4 + (ow + kw)
                        Wc[i, o] = w[c_out, 0, kh, kw]
    return Wc, bc


def init_params(key):
    ks = jax.random.split(key, 8)
    # Conv2d(1, 16, 3)
    w_conv = jax.random.normal(ks[0], (16, 1, 3, 3), jnp.float32) * 0.2
    b_conv = jax.random.normal(ks[1], (16,), jnp.float32) * 0.1
    # Linear(64, 16) stored (in, out) for the f32 reference
    wl = jax.random.normal(ks[2], (64, 16), jnp.float32) * 0.1
    bl = jax.random.normal(ks[3], (1, 16), jnp.float32) * 0.1
    # Linear(16, 16)
    w1 = jax.random.normal(ks[4], (16, 16), jnp.float32) * 0.2
    b1 = jax.random.normal(ks[5], (1, 16), jnp.float32) * 0.1
    # Linear(16, 16)
    w2 = jax.random.normal(ks[6], (16, 16), jnp.float32) * 0.2
    b2 = jax.random.normal(ks[7], (1, 16), jnp.float32) * 0.1

    wc, bc = build_folded_conv(w_conv, b_conv)

    # Kernel params: bf16 weights (cast once), f32 biases.  Layers 1-3 are (in, out)
    # so the small weight is the MXU-stationary operand; the last layer keeps the
    # PyTorch (out, in) orientation + a column bias because it is emitted
    # feature-major via the NT dot_general.
    kernel_params = (
        jnp.asarray(wc, jnp.bfloat16), jnp.asarray(bc, jnp.float32),
        jnp.asarray(wl, jnp.bfloat16), jnp.asarray(bl, jnp.float32),
        jnp.asarray(w1, jnp.bfloat16), jnp.asarray(b1, jnp.float32),
        jnp.asarray(w2.T, jnp.bfloat16), jnp.asarray(b2.T, jnp.float32),
    )
    raw_params = (w_conv, b_conv, wl, bl, w1, b1, w2, b2)
    return kernel_params, raw_params


# --------------------------- pure-JAX reference -----------------------------

def reference_forward(x_flat, raw_params):
    """Literal f32 translation of the PyTorch forward (NCHW conv + Flatten)."""
    w_conv, b_conv, wl, bl, w1, b1, w2, b2 = raw_params
    B = x_flat.shape[0]
    x = x_flat.reshape(B, 1, 4, 4)
    y = lax.conv_general_dilated(
        x, w_conv, window_strides=(1, 1), padding="VALID",
        dimension_numbers=("NCHW", "OIHW", "NCHW"))
    y = y + b_conv.reshape(1, 16, 1, 1)
    y = jnp.maximum(y, 0.0)
    y = y.reshape(B, 64)                      # Flatten over (C, H, W)
    h = jnp.maximum(y @ wl + bl, 0.0)
    h = jnp.maximum(h @ w1 + b1, 0.0)
    return h @ w2 + b2


# --------------------------------- main --------------------------------------

if __name__ == "__main__":
    key = jax.random.PRNGKey(0)
    k_param, k_x1, k_x2 = jax.random.split(key, 3)
    kernel_params, raw_params = init_params(k_param)

    # --- Test 1: ragged batch with small explicit tiles -----------------------
    # B=700, block_b=512, sub_b=128 -> 2 grid steps (second block partially
    # out-of-bounds), 4-step inner sub-tile loop, "parallel" batch axis.
    B1 = 700
    x1 = jax.random.normal(k_x1, (B1, 16), jnp.float32).astype(jnp.bfloat16)
    out1 = jax.block_until_ready(
        autoencoder_forward(x1, kernel_params, block_b=512, sub_b=128))
    assert out1.shape == (16, B1) and out1.dtype == jnp.bfloat16
    ref1 = np.asarray(reference_forward(x1.astype(jnp.float32), raw_params))
    # bf16 weights/activations (f32 accumulation) vs f32 reference -> loose tolerance.
    np.testing.assert_allclose(np.asarray(out1.astype(jnp.float32).T), ref1,
                               rtol=5e-2, atol=5e-2)

    # --- Test 2: default (production) tiling on a modest batch ----------------
    B2 = 4096
    x2 = jax.random.normal(k_x2, (B2, 16), jnp.float32).astype(jnp.bfloat16)
    out2 = jax.block_until_ready(autoencoder_forward(x2, kernel_params))
    ref2 = np.asarray(reference_forward(x2.astype(jnp.float32), raw_params))
    np.testing.assert_allclose(np.asarray(out2.astype(jnp.float32).T), ref2,
                               rtol=5e-2, atol=5e-2)

    print("KERNEL_OK")
</pallas_src>

<mosaic_0001>
module attributes {stable_mosaic.version = 11 : i64} {
  func.func @kernel(%arg0: i32, %arg1: memref<512x16xbf16, #tpu.memory_space<vmem>>, %arg2: memref<16x64xbf16, #tpu.memory_space<vmem>>, %arg3: memref<1x64xf32, #tpu.memory_space<vmem>>, %arg4: memref<64x16xbf16, #tpu.memory_space<vmem>>, %arg5: memref<1x16xf32, #tpu.memory_space<vmem>>, %arg6: memref<16x16xbf16, #tpu.memory_space<vmem>>, %arg7: memref<1x16xf32, #tpu.memory_space<vmem>>, %arg8: memref<16x16xbf16, #tpu.memory_space<vmem>>, %arg9: memref<16x1xf32, #tpu.memory_space<vmem>>, %arg10: memref<16x512xbf16, #tpu.memory_space<vmem>>) attributes {dimension_semantics = [#tpu.dimension_semantics<parallel>], iteration_bounds = array<i64: 2>, scalar_prefetch = 0 : i64, scratch_operands = 0 : i64, tpu.core_type = #tpu.core_type<tc>, window_params = [{transform_indices = @transform_0, window_bounds = array<i64: 512, 16>}, {pipeline_mode = #tpu.pipeline_mode<synchronous>, transform_indices = @transform_1, window_bounds = array<i64: 16, 64>}, {pipeline_mode = #tpu.pipeline_mode<synchronous>, transform_indices = @transform_2, window_bounds = array<i64: 1, 64>}, {pipeline_mode = #tpu.pipeline_mode<synchronous>, transform_indices = @transform_3, window_bounds = array<i64: 64, 16>}, {pipeline_mode = #tpu.pipeline_mode<synchronous>, transform_indices = @transform_4, window_bounds = array<i64: 1, 16>}, {pipeline_mode = #tpu.pipeline_mode<synchronous>, transform_indices = @transform_5, window_bounds = array<i64: 16, 16>}, {pipeline_mode = #tpu.pipeline_mode<synchronous>, transform_indices = @transform_6, window_bounds = array<i64: 1, 16>}, {pipeline_mode = #tpu.pipeline_mode<synchronous>, transform_indices = @transform_7, window_bounds = array<i64: 16, 16>}, {pipeline_mode = #tpu.pipeline_mode<synchronous>, transform_indices = @transform_8, window_bounds = array<i64: 16, 1>}, {transform_indices = @transform_9, window_bounds = array<i64: 16, 512>}]} {
    %c0 = arith.constant 0 : index
    %c0_0 = arith.constant 0 : index
    %0 = vector.load %arg2[%c0, %c0_0] : memref<16x64xbf16, #tpu.memory_space<vmem>>, vector<16x64xbf16>
    %c0_1 = arith.constant 0 : index
    %c0_2 = arith.constant 0 : index
    %1 = vector.load %arg3[%c0_1, %c0_2] : memref<1x64xf32, #tpu.memory_space<vmem>>, vector<1x64xf32>
    %c0_3 = arith.constant 0 : index
    %c0_4 = arith.constant 0 : index
    %2 = vector.load %arg4[%c0_3, %c0_4] : memref<64x16xbf16, #tpu.memory_space<vmem>>, vector<64x16xbf16>
    %c0_5 = arith.constant 0 : index
    %c0_6 = arith.constant 0 : index
    %3 = vector.load %arg5[%c0_5, %c0_6] : memref<1x16xf32, #tpu.memory_space<vmem>>, vector<1x16xf32>
    %c0_7 = arith.constant 0 : index
    %c0_8 = arith.constant 0 : index
    %4 = vector.load %arg6[%c0_7, %c0_8] : memref<16x16xbf16, #tpu.memory_space<vmem>>, vector<16x16xbf16>
    %c0_9 = arith.constant 0 : index
    %c0_10 = arith.constant 0 : index
    %5 = vector.load %arg7[%c0_9, %c0_10] : memref<1x16xf32, #tpu.memory_space<vmem>>, vector<1x16xf32>
    %c0_11 = arith.constant 0 : index
    %c0_12 = arith.constant 0 : index
    %6 = vector.load %arg8[%c0_11, %c0_12] : memref<16x16xbf16, #tpu.memory_space<vmem>>, vector<16x16xbf16>
    %c0_13 = arith.constant 0 : index
    %c0_14 = arith.constant 0 : index
    %7 = vector.load %arg9[%c0_13, %c0_14] : memref<16x1xf32, #tpu.memory_space<vmem>>, vector<16x1xf32>
    %c0_i32 = arith.constant 0 : i32
    %c4_i32 = arith.constant 4 : i32
    %8 = arith.addi %c0_i32, %c4_i32 : i32
    %c1_i32 = arith.constant 1 : i32
    scf.for %arg11 = %c0_i32 to %8 step %c1_i32  : i32 {
      %c128_i32 = arith.constant 128 : i32
      %9 = arith.muli %arg11, %c128_i32 : i32
      %10 = tpu.assume_multiple %9, 128 : i32
      %11 = arith.index_cast %10 : i32 to index
      %c0_16 = arith.constant 0 : index
      %12 = vector.load %arg1[%11, %c0_16] : memref<512x16xbf16, #tpu.memory_space<vmem>>, vector<128x16xbf16>
      %cst = arith.constant dense<0.000000e+00> : vector<128x64xf32>
      %13 = tpu.matmul %12, %0, %cst {dimension_numbers = #tpu.dot_dimension_numbers<[1], [0], [0], [1], [0, 0, 1, 1], [], []>} : vector<128x16xbf16>, vector<16x64xbf16>, vector<128x64xf32> -> vector<128x64xf32>
      %14 = vector.broadcast %1 : vector<1x64xf32> to vector<128x64xf32>
      %15 = arith.addf %13, %14 : vector<128x64xf32>
      %cst_17 = arith.constant 0.000000e+00 : f32
      %16 = vector.broadcast %cst_17 : f32 to vector<128x64xf32>
      %17 = arith.maximumf %15, %16 : vector<128x64xf32>
      %18 = arith.truncf %17 : vector<128x64xf32> to vector<128x64xbf16>
      %cst_18 = arith.constant dense<0.000000e+00> : vector<128x16xf32>
      %19 = tpu.matmul %18, %2, %cst_18 {dimension_numbers = #tpu.dot_dimension_numbers<[1], [0], [0], [1], [0, 0, 1, 1], [], []>} : vector<128x64xbf16>, vector<64x16xbf16>, vector<128x16xf32> -> vector<128x16xf32>
      %20 = vector.broadcast %3 : vector<1x16xf32> to vector<128x16xf32>
      %21 = arith.addf %19, %20 : vector<128x16xf32>
      %cst_19 = arith.constant 0.000000e+00 : f32
      %22 = vector.broadcast %cst_19 : f32 to vector<128x16xf32>
      %23 = arith.maximumf %21, %22 : vector<128x16xf32>
      %24 = arith.truncf %23 : vector<128x16xf32> to vector<128x16xbf16>
      %cst_20 = arith.constant dense<0.000000e+00> : vector<128x16xf32>
      %25 = tpu.matmul %24, %4, %cst_20 {dimension_numbers = #tpu.dot_dimension_numbers<[1], [0], [0], [1], [0, 0, 1, 1], [], []>} : vector<128x16xbf16>, vector<16x16xbf16>, vector<128x16xf32> -> vector<128x16xf32>
      %26 = vector.broadcast %5 : vector<1x16xf32> to vector<128x16xf32>
      %27 = arith.addf %25, %26 : vector<128x16xf32>
      %cst_21 = arith.constant 0.000000e+00 : f32
      %28 = vector.broadcast %cst_21 : f32 to vector<128x16xf32>
      %29 = arith.maximumf %27, %28 : vector<128x16xf32>
      %30 = arith.truncf %29 : vector<128x16xf32> to vector<128x16xbf16>
      %cst_22 = arith.constant dense<0.000000e+00> : vector<16x128xf32>
      %31 = tpu.matmul %6, %30, %cst_22 {dimension_numbers = #tpu.dot_dimension_numbers<[1], [1], [0], [0], [0, 0, 1, 0], [], []>} : vector<16x16xbf16>, vector<128x16xbf16>, vector<16x128xf32> -> vector<16x128xf32>
      %32 = vector.broadcast %7 : vector<16x1xf32> to vector<16x128xf32>
      %33 = arith.addf %31, %32 : vector<16x128xf32>
      %34 = arith.truncf %33 : vector<16x128xf32> to vector<16x128xbf16>
      %c0_23 = arith.constant 0 : index
      %35 = arith.index_cast %10 : i32 to index
      %36 = vector.load %arg10[%c0_23, %35] : memref<16x512xbf16, #tpu.memory_space<vmem>>, vector<16x128xbf16>
      tpu.vector_store %arg10[%c0_23, %35], %34 {strides = array<i32>} : memref<16x512xbf16, #tpu.memory_space<vmem>>, vector<16x128xbf16>,
    }
    %c4_i32_15 = arith.constant 4 : i32
    return
  }
  func.func @transform_0(%arg0: i32) -> (i32, i32) {
    %c0_i32 = arith.constant 0 : i32
    %c0_i32_0 = arith.constant 0 : i32
    return %arg0, %c0_i32 : i32, i32
  }
  func.func @transform_1(%arg0: i32) -> (i32, i32) {
    %c0_i32 = arith.constant 0 : i32
    %c0_i32_0 = arith.constant 0 : i32
    %c0_i32_1 = arith.constant 0 : i32
    return %c0_i32, %c0_i32_0 : i32, i32
  }
  func.func @transform_2(%arg0: i32) -> (i32, i32) {
    %c0_i32 = arith.constant 0 : i32
    %c0_i32_0 = arith.constant 0 : i32
    %c0_i32_1 = arith.constant 0 : i32
    return %c0_i32, %c0_i32_0 : i32, i32
  }
  func.func @transform_3(%arg0: i32) -> (i32, i32) {
    %c0_i32 = arith.constant 0 : i32
    %c0_i32_0 = arith.constant 0 : i32
    %c0_i32_1 = arith.constant 0 : i32
    return %c0_i32, %c0_i32_0 : i32, i32
  }
  func.func @transform_4(%arg0: i32) -> (i32, i32) {
    %c0_i32 = arith.constant 0 : i32
    %c0_i32_0 = arith.constant 0 : i32
    %c0_i32_1 = arith.constant 0 : i32
    return %c0_i32, %c0_i32_0 : i32, i32
  }
  func.func @transform_5(%arg0: i32) -> (i32, i32) {
    %c0_i32 = arith.constant 0 : i32
    %c0_i32_0 = arith.constant 0 : i32
    %c0_i32_1 = arith.constant 0 : i32
    return %c0_i32, %c0_i32_0 : i32, i32
  }
  func.func @transform_6(%arg0: i32) -> (i32, i32) {
    %c0_i32 = arith.constant 0 : i32
    %c0_i32_0 = arith.constant 0 : i32
    %c0_i32_1 = arith.constant 0 : i32
    return %c0_i32, %c0_i32_0 : i32, i32
  }
  func.func @transform_7(%arg0: i32) -> (i32, i32) {
    %c0_i32 = arith.constant 0 : i32
    %c0_i32_0 = arith.constant 0 : i32
    %c0_i32_1 = arith.constant 0 : i32
    return %c0_i32, %c0_i32_0 : i32, i32
  }
  func.func @transform_8(%arg0: i32) -> (i32, i32) {
    %c0_i32 = arith.constant 0 : i32
    %c0_i32_0 = arith.constant 0 : i32
    %c0_i32_1 = arith.constant 0 : i32
    return %c0_i32, %c0_i32_0 : i32, i32
  }
  func.func @transform_9(%arg0: i32) -> (i32, i32) {
    %c0_i32 = arith.constant 0 : i32
    %c0_i32_0 = arith.constant 0 : i32
    return %c0_i32, %arg0 : i32, i32
  }
}

</mosaic_0001>

<bundles_post_ra>
// kernel: tpu_custom_call.1
= control target key start
LH: loop header
LB: loop body
LE: loop exit
PB: predicated region body
PF: predicated region fallthrough
CT: control target
= control target key end

     0   :  { %s1849_s0 = inlined_call_operand.vmem [shape: bf16[700,16], index: 0, kind: input, shape index: {}]   ;;  %s1850_s1 = inlined_call_operand.vmem [shape: bf16[16,64], index: 1, kind: input, shape index: {}]   ;;  %s1851_s2 = inlined_call_operand.vmem [shape: f32[1,64], index: 2, kind: input, shape index: {}]   ;;  %s1852_s3 = inlined_call_operand.vmem [shape: bf16[64,16], index: 3, kind: input, shape index: {}]   ;;  %s1853_s4 = inlined_call_operand.vmem [shape: f32[1,16], index: 4, kind: input, shape index: {}]   ;;  %s1854_s5 = inlined_call_operand.vmem [shape: bf16[16,16], index: 5, kind: input, shape index: {}]   ;;  %s1855_s6 = inlined_call_operand.vmem [shape: f32[1,16], index: 6, kind: input, shape index: {}]   ;;  %s1856_s7 = inlined_call_operand.vmem [shape: bf16[16,16], index: 7, kind: input, shape index: {}]   ;;  %s1857_s8 = inlined_call_operand.vmem [shape: f32[16,1], index: 8, kind: input, shape index: {}]   ;;  %s1858_s9 = inlined_call_operand.hbm [shape: bf16[16,700], index: 9, kind: output, shape index: {}]  }
   0x1   :  { %1860 = sst [smem:[#allocation5_spill]] %s1850_s1 }
   0x2   :  { %14 = vsyncpa [#allocation3], 0 }
   0x3   :  { %16 = vsyncpa [#allocation3 + $0x1], 0  ;;  %s1502_s30 = smov 0   ;;  %s1504_s10 = smov 0  }
   0x4   :  { %s1506_s11 = smov 0   ;;  %s1508_s12 = smov 0  }
   0x5 LB: > { %s1523_s13 = sadd.s32 4294967295, %s1440_s12   ;;  %s1125_s14 = sadd.s32 4294967294, %s1440_s12   ;;  %s1440_s12 = sphi %s1508_s12, %s1868_s12   ;;  %s1436_s11 = sphi %s1506_s11, %s1867_s11   ;;  %s1432_s10 = sphi %s1504_s10, %s1866_s10   ;;  %s1428_s30 = sphi %s1502_s30, %s1865_s30  }
   0x6   : > { %s1527_s15 = sadd.s32 1, %s1440_s12   ;;  %s223_s16 = sadd.s32 1, %s1436_s11 }
   0x7   : > { %s220_s17 = ssub.s32 %s1440_s12, %s1527_s15  ;;  %p233_p0 = scmp.ne.s32.totalorder %s1436_s11, %s1432_s10 }
   0x8   : > { %p221_p1 = scmp.eq.s32.totalorder %s220_s17, 0  ;;  %p234_p2 = scmp.eq.s32.totalorder %s1523_s13, 1 }
   0x9   : > { %p239_p3 = scmp.ne.s32.totalorder %s1432_s10, %s1428_s30  ;;  %p240_p4 = scmp.eq.s32.totalorder %s1125_s14, 1 }
   0xa   : > { %s1538_s18 = scalar_select %p221_p1, %s1436_s11, %s223_s16  }
   0xb   : > { %p1540_p5 = por %p234_p2, %p233_p0  ;;  %p1544_p6 = por %p240_p4, %p239_p3 }
   0xc   : > { %p1128_p7 = scmp.ge.s32.totalorder %s1440_s12, 1  ;;  %p299_p8 = scmp.lt.s32.totalorder %s1440_s12, 3 }
   0xe   : > { %p300_p9 = pnand %p1128_p7, %p299_p8 }
   0xf   : > { %s1859_s21 = sand.u32 (!%p300_p9), 1, %s1432_s10   ;;  %s1130_s22 = sshll.u32 (!%p300_p9), %s1523_s13, 6  ;;  %v1569_v2 = vld [vmem:[%s1851_s2] ss:$0 sm:$0xff] (!%p300_p9)  ;;  %v1579_v4 = vld [vmem:[%s1852_s3 + $0x4] sm:$0xf] (!%p300_p9) }
  0x10   : > { %303 = sbr.rel (%p300_p9) target bundleno = 1016 (0x3f8), region = 56  ;;  %s1863_s1 = sld [smem:[#allocation5_spill]] (!%p300_p9)  ;;  %v1574_v3 = vld [vmem:[%s1852_s3] sm:$0xf] (!%p300_p9)  ;;  %v1584_v5 = vld [vmem:[%s1852_s3 + $0x8] sm:$0xf] (!%p300_p9) }
  0x11   : > { %s1564_s27 = sshll.u32 (!%p300_p9), %s1859_s21, 5  ;;  %p344_p10 = scmp.lt.s32.totalorder (!%p300_p9), %s1130_s22, 87  ;;  %v1589_v6 = vld [vmem:[%s1857_s8] sm:$0xff] (!%p300_p9)  ;;  %v1594_v7 = vld [vmem:[%s1852_s3 + $0xc] sm:$0xf] (!%p300_p9) }
  0x12   : > { %v1599_v8 = vld [vmem:[%s1852_s3 + $0x10] sm:$0xf] (!%p300_p9)  ;;  %v1604_v9 = vld [vmem:[%s1857_s8 + $0x8] sm:$0xff] (!%p300_p9)  ;;  %v1609_v10 = vld [vmem:[%s1852_s3 + $0x14] sm:$0xf] (!%p300_p9)  ;;  %s1657_s24 = smov (!%p300_p9), 0  }
  0x13   : > { %v1614_v11 = vld [vmem:[%s1852_s3 + $0x18] sm:$0xf] (!%p300_p9)  ;;  %v1619_v12 = vld [vmem:[%s1852_s3 + $0x1c] sm:$0xf] (!%p300_p9)  ;;  %v1624_v13 = vld [vmem:[%s1853_s4] ss:$0 sm:$0xff] (!%p300_p9) }
  0x14   : > { %v1629_v14 = vld [vmem:[%s1854_s5] sm:$0xf] (!%p300_p9)  ;;  %v1639_v15 = vld [vmem:[%s1854_s5 + $0x4] sm:$0xf] (!%p300_p9) }
  0x15   : > { %v1644_v16 = vld [vmem:[%s1855_s6] ss:$0 sm:$0xff] (!%p300_p9)  ;;  %v1654_v18 = vld [vmem:[%s1856_s7 + $0x4] sm:$0xf] (!%p300_p9) }
  0x16   : > { %v1555_v0 = vld [vmem:[%s1863_s1] sm:$0xf] (!%p300_p9)  ;;  %v1560_v1 = vld [vmem:[%s1863_s1 + $0x4] sm:$0xf] (!%p300_p9) }
  0x17   : > { %s1870_s22 = smov (!%p344_p10, %s1130_s22), 87  ;;  %v1649_v17 = vld [vmem:[%s1856_s7] sm:$0xf] }
  0x18   : > { %s1131_s14 = sshll.u32 %s1870_s22, 2 }
  0x19   : > { %s1634_s26 = scalar_lea.vmem %s1849_s0, %s1131_s14  ;;  %s338_s14 = scalar_lea.vmem [#allocation2], %s1564_s27 }
  0x1a LB: >> { %v1143_v19 = vcombine.low %v1555_v0, %v1560_v1  ;;  %v1153_v20 = vcombine.low %v1574_v3, %v1579_v4  ;;  %v1154_v21 = vcombine.low %v1584_v5, %v1594_v7  ;;  %s1132_s1 = sshll.u32 %s1444_s24, 7  ;;  %vm457_vm0 = vcmask 130048   ;;  %s383_s24 = sadd.s32 1, %s1444_s24   ;;  %s1444_s24 = sphi %s1657_s24, %s383_s24  }
  0x1b   : >> { %s385_s25 = sshra.s32 %s1132_s1, 3  ;;  %v1155_v30 = vcombine.low %v1599_v8, %v1609_v10  ;;  %v1156_v31 = vcombine.low %v1614_v11, %v1619_v12  ;;  %v1166_v32 = vcombine.low %v1629_v14, %v1639_v15  ;;  %vm633_vm1 = vcmask 523264   ;;  %s1027_s29 = sshra.s32 %s1132_s1, 7 }
  0x1c   : >> { %1234 = vmatprep.subr.bf16.mxu0 %v1143_v19  ;;  %1252 = vmatprep.subr.bf16.mxu1 %v1153_v20  ;;  %s1133_s28 = sshll.u32 %s385_s25, 2  ;;  %vm1447_vm2 = vmmov 0   ;;  %s1179_s16 = sshll.u32 %s1027_s29, 2 }
  0x1d   : >> { %1235 = vmatpush3.bf16.msra.mxu0 %v1143_v19  ;;  %1253 = vmatpush3.bf16.msra.mxu1 %v1153_v20  ;;  %s388_s22 = scalar_lea.vmem %s1634_s26, %s1133_s28  ;;  %s1030_s17 = scalar_lea.vmem %s338_s14, %s1179_s16 [#allocation2] }
  0x1e   : >> { %1254 = vmatprep.subr.bf16.mxu1 %v1154_v21  ;;  %v1366_v22 = vld [vmem:[%s388_s22] sm:$0xff]   ;;  %v1367_v23 = vld [vmem:[%s388_s22 + $0x8] sm:$0xff]   ;;  %v1368_v24 = vld [vmem:[%s388_s22 + $0x10] sm:$0xff]   ;;  %1276 = vmatprep.subr.bf16.mxu0 %v1166_v32  ;;  %p380_p11 = scmp.ge.s32.totalorder %s383_s24, 4  }
  0x1f   : >> { %1236 = vmatprep.mubr.msk.bf16.mxu0 %vm457_vm0, %v1366_v22  ;;  %v1369_v25 = vld [vmem:[%s388_s22 + $0x18] sm:$0xff]   ;;  %v1370_v26 = vld [vmem:[%s388_s22 + $0x20] sm:$0xff]   ;;  %v1371_v27 = vld [vmem:[%s388_s22 + $0x28] sm:$0xff]   ;;  %s1864_s23 = sand.u32 (%p380_p11), 1, %s1432_s10  }
  0x20   : >> { %1237 = vmatmul.mubr.msk.bf16.vlgmr.msra.gmra.mrb[0].mxu0 %vm457_vm0, %v1367_v23  ;;  %v1372_v28 = vld [vmem:[%s388_s22 + $0x30] sm:$0xff]   ;;  %v1373_v29 = vld [vmem:[%s388_s22 + $0x38] sm:$0xff]   ;;  %s1781_s21 = scalar_lea.sflag (%p380_p11), [#allocation3], %s1864_s23 }
  0x21   : >> { %1255 = vmatpush3.bf16.msra.mxu1 %v1154_v21  ;;  %1240 = vmatprep.mubr.msk.bf16.mxu0 %vm457_vm0, %v1368_v24 }
  0x22   : >> { %1256 = vmatprep.subr.bf16.mxu1 %v1155_v30  ;;  %1277 = vmatpush3.bf16.msra.mxu0 %v1166_v32 }
  0x25   : >> { %1257 = vmatpush3.bf16.msra.mxu1 %v1155_v30 }
  0x26   : >> { %1258 = vmatprep.subr.bf16.mxu1 %v1156_v31 }
  0x28   : >> { %1241 = vmatmul.mubr.msk.bf16.gmra.mrb[4].mxu0 %vm457_vm0, %v1369_v25 }
  0x29   : >> { %1244 = vmatprep.mubr.msk.bf16.mxu0 %vm457_vm0, %v1370_v26  ;;  %1259 = vmatpush3.bf16.msra.mxu1 %v1156_v31 }
  0x30   : >> { %1245 = vmatmul.mubr.msk.bf16.gmra.mrb[8].mxu0 %vm457_vm0, %v1371_v27 }
  0x31   : >> { %1248 = vmatprep.mubr.msk.bf16.mxu0 %vm457_vm0, %v1372_v28 }
  0x38   : >> { %1249 = vmatmul.mubr.msk.bf16.gmra.mrb[12].mxu0 %vm457_vm0, %v1373_v29 }
  0xf3   : >> { %v1238_v33 = vpop.f32.mrb[0].mxu0 }
  0xf4   : >> { %v525_v34 = vadd.f32 %v1238_v33, %v1569_v2  ;;  %v516_v35 = vpop.f32.mrb[1].mxu0 }
  0xf5   : >> { %v517_v36 = vadd.f32 %v1569_v2, %v516_v35  ;;  %v1239_v37 = vpop.f32.mrb[2].mxu0 }
  0xf6   : >> { %v528_v38 = vadd.f32 %v1239_v37, %v1569_v2  ;;  %v519_v39 = vpop.f32.mrb[3].mxu0  ;;  %v581_v41 = vmax.f32 %v525_v34, 0.0 }
  0xf7   : >> { %v520_v40 = vadd.f32 %v1569_v2, %v519_v39  ;;  %v579_v43 = vmax.f32 %v517_v36, 0.0 }
  0xf8   : >> { %v582_v42 = vmax.f32 %v528_v38, 0.0 }
  0xf9   : >> { %v580_v44 = vmax.f32 %v520_v40, 0.0 }
  0xfa   : >> { %v596_v45 = vpack.c.bf16 %v582_v42, %v581_v41 }
  0xfb   : >> { %v1242_v46 = vpop.f32.mrb[4].mxu0  ;;  %v595_v47 = vpack.c.bf16 %v580_v44, %v579_v43 }
  0xfc   : >> { %v541_v48 = vadd.f32 %v1242_v46, %v1569_v2  ;;  %v532_v49 = vpop.f32.mrb[5].mxu0 }
  0xfd   : >> { %v533_v50 = vadd.f32 %v1569_v2, %v532_v49  ;;  %v1243_v51 = vpop.f32.mrb[6].mxu0  ;;  %1260 = vmatprep.mubr.msk.bf16.mxu1 %vm633_vm1, %v595_v47 }
  0xfe   : >> { %v585_v52 = vmax.f32 %v541_v48, 0.0  ;;  %v544_v53 = vadd.f32 %v1243_v51, %v1569_v2  ;;  %v535_v54 = vpop.f32.mrb[7].mxu0  ;;  %1261 = vmatmul.mubr.msk.bf16.vlgmr.msra.gmra.mrb[0].mxu1 %vm633_vm1, %v596_v45 }
  0xff   : >> { %v583_v55 = vmax.f32 %v533_v50, 0.0  ;;  %v536_v56 = vadd.f32 %v1569_v2, %v535_v54 }
 0x100   : >> { %v586_v57 = vmax.f32 %v544_v53, 0.0 }
 0x101   : >> { %v584_v58 = vmax.f32 %v536_v56, 0.0 }
 0x102   : >> { %v598_v59 = vpack.c.bf16 %v586_v57, %v585_v52 }
 0x103   : >> { %v597_v60 = vpack.c.bf16 %v584_v58, %v583_v55  ;;  %v1246_v61 = vpop.f32.mrb[8].mxu0 }
 0x104   : >> { %v557_v62 = vadd.f32 %v1246_v61, %v1569_v2  ;;  %v548_v63 = vpop.f32.mrb[9].mxu0 }
 0x105   : >> { %1264 = vmatprep.mubr.msk.bf16.mxu1 %vm633_vm1, %v597_v60  ;;  %v549_v19 = vadd.f32 %v1569_v2, %v548_v63  ;;  %v1247_v20 = vpop.f32.mrb[10].mxu0 }
 0x106   : >> { %1265 = vmatmul.mubr.msk.bf16.gmra.mrb[4].mxu1 %vm633_vm1, %v598_v59  ;;  %v589_v21 = vmax.f32 %v557_v62, 0.0  ;;  %v560_v22 = vadd.f32 %v1247_v20, %v1569_v2  ;;  %v551_v23 = vpop.f32.mrb[11].mxu0 }
 0x107   : >> { %v587_v24 = vmax.f32 %v549_v19, 0.0  ;;  %v552_v25 = vadd.f32 %v1569_v2, %v551_v23 }
 0x108   : >> { %v590_v26 = vmax.f32 %v560_v22, 0.0 }
 0x109   : >> { %v588_v27 = vmax.f32 %v552_v25, 0.0 }
 0x10a   : >> { %v600_v28 = vpack.c.bf16 %v590_v26, %v589_v21 }
 0x10b   : >> { %v599_v29 = vpack.c.bf16 %v588_v27, %v587_v24  ;;  %v1250_v30 = vpop.f32.mrb[12].mxu0 }
 0x10c   : >> { %v573_v31 = vadd.f32 %v1250_v30, %v1569_v2  ;;  %v564_v32 = vpop.f32.mrb[13].mxu0 }
 0x10d   : >> { %1268 = vmatprep.mubr.msk.bf16.mxu1 %vm633_vm1, %v599_v29  ;;  %v565_v33 = vadd.f32 %v1569_v2, %v564_v32  ;;  %v1251_v34 = vpop.f32.mrb[14].mxu0 }
 0x10e   : >> { %1269 = vmatmul.mubr.msk.bf16.gmra.mrb[8].mxu1 %vm633_vm1, %v600_v28  ;;  %v593_v35 = vmax.f32 %v573_v31, 0.0  ;;  %v576_v36 = vadd.f32 %v1251_v34, %v1569_v2  ;;  %v567_v37 = vpop.f32.mrb[15].mxu0 }
 0x10f   : >> { %v591_v38 = vmax.f32 %v565_v33, 0.0  ;;  %v568_v39 = vadd.f32 %v1569_v2, %v567_v37 }
 0x110   : >> { %v594_v40 = vmax.f32 %v576_v36, 0.0 }
 0x111   : >> { %v592_v41 = vmax.f32 %v568_v39, 0.0 }
 0x112   : >> { %v602_v42 = vpack.c.bf16 %v594_v40, %v593_v35 }
 0x113   : >> { %v601_v43 = vpack.c.bf16 %v592_v41, %v591_v38 }
 0x115   : >> { %1272 = vmatprep.mubr.msk.bf16.mxu1 %vm633_vm1, %v601_v43 }
 0x116   : >> { %1273 = vmatmul.mubr.msk.bf16.gmra.mrb[12].mxu1 %vm633_vm1, %v602_v42 }
 0x1d1   : >> { %v1262_v44 = vpop.f32.mrb[0].mxu1 }
 0x1d2   : >> { %v701_v45 = vadd.f32 %v1262_v44, %v1624_v13  ;;  %v692_v46 = vpop.f32.mrb[1].mxu1 }
 0x1d3   : >> { %v693_v47 = vadd.f32 %v1624_v13, %v692_v46  ;;  %v1263_v48 = vpop.f32.mrb[2].mxu1 }
 0x1d4   : >> { %v704_v49 = vadd.f32 %v1263_v48, %v1624_v13  ;;  %v695_v50 = vpop.f32.mrb[3].mxu1  ;;  %v757_v52 = vmax.f32 %v701_v45, 0.0 }
 0x1d5   : >> { %v696_v51 = vadd.f32 %v1624_v13, %v695_v50  ;;  %v755_v54 = vmax.f32 %v693_v47, 0.0 }
 0x1d6   : >> { %v758_v53 = vmax.f32 %v704_v49, 0.0 }
 0x1d7   : >> { %v756_v55 = vmax.f32 %v696_v51, 0.0 }
 0x1d8   : >> { %v772_v56 = vpack.c.bf16 %v758_v53, %v757_v52 }
 0x1d9   : >> { %v771_v57 = vpack.c.bf16 %v756_v55, %v755_v54  ;;  %v1266_v58 = vpop.f32.mrb[4].mxu1  ;;  %v1446_v55 = vmov 0.0  }
 0x1da   : >> { %v717_v59 = vadd.f32 %v1266_v58, %v1624_v13  ;;  %v708_v60 = vpop.f32.mrb[5].mxu1  ;;  %1294 = vmatprep.subr.bf16.mxu1 %v1446_v55  ;;  %1310 = vmatprep.mubr.msk.bf16.mxu1 %vm1447_vm2, %v1446_v55 }
 0x1db   : >> { %v709_v61 = vadd.f32 %v1624_v13, %v708_v60  ;;  %v1267_v62 = vpop.f32.mrb[6].mxu1  ;;  %1278 = vmatprep.mubr.msk.bf16.mxu0 %vm457_vm0, %v771_v57 }
 0x1dc   : >> { %v761_v63 = vmax.f32 %v717_v59, 0.0  ;;  %v720_v19 = vadd.f32 %v1267_v62, %v1624_v13  ;;  %v711_v20 = vpop.f32.mrb[7].mxu1  ;;  %1279 = vmatmul.mubr.msk.bf16.vlgmr.msra.gmra.mrb[16].mxu0 %vm457_vm0, %v772_v56  ;;  %v1448_v56 = vmov 0  }
 0x1dd   : >> { %v759_v21 = vmax.f32 %v709_v61, 0.0  ;;  %v712_v22 = vadd.f32 %v1624_v13, %v711_v20  ;;  %1365 = vset.pattern.permute.xlu0 %v1448_v56 }
 0x1de   : >> { %v762_v23 = vmax.f32 %v720_v19, 0.0  ;;  %938 = vperm.xlu0 %1365, %v1589_v6  }
 0x1df   : >> { %v760_v24 = vmax.f32 %v712_v22, 0.0 }
 0x1e0   : >> { %v774_v25 = vpack.c.bf16 %v762_v23, %v761_v63 }
 0x1e1   : >> { %v773_v26 = vpack.c.bf16 %v760_v24, %v759_v21  ;;  %v1270_v27 = vpop.f32.mrb[8].mxu1 }
 0x1e2   : >> { %v733_v28 = vadd.f32 %v1270_v27, %v1624_v13  ;;  %v724_v29 = vpop.f32.mrb[9].mxu1  ;;  %943 = vperm.xlu0 %1365, %v1604_v9  }
 0x1e3   : >> { %1282 = vmatprep.mubr.msk.bf16.mxu0 %vm457_vm0, %v773_v26  ;;  %v725_v30 = vadd.f32 %v1624_v13, %v724_v29  ;;  %v1271_v31 = vpop.f32.mrb[10].mxu1 }
 0x1e4   : >> { %1283 = vmatmul.mubr.msk.bf16.gmra.mrb[20].mxu0 %vm457_vm0, %v774_v25  ;;  %v765_v32 = vmax.f32 %v733_v28, 0.0  ;;  %v736_v33 = vadd.f32 %v1271_v31, %v1624_v13  ;;  %v727_v34 = vpop.f32.mrb[11].mxu1 }
 0x1e5   : >> { %v763_v35 = vmax.f32 %v725_v30, 0.0  ;;  %v728_v36 = vadd.f32 %v1624_v13, %v727_v34 }
 0x1e6   : >> { %v766_v37 = vmax.f32 %v736_v33, 0.0 }
 0x1e7   : >> { %v764_v38 = vmax.f32 %v728_v36, 0.0 }
 0x1e8   : >> { %v776_v39 = vpack.c.bf16 %v766_v37, %v765_v32 }
 0x1e9   : >> { %v775_v40 = vpack.c.bf16 %v764_v38, %v763_v35  ;;  %v1274_v41 = vpop.f32.mrb[12].mxu1 }
 0x1ea   : >> { %v749_v42 = vadd.f32 %v1274_v41, %v1624_v13  ;;  %v740_v43 = vpop.f32.mrb[13].mxu1 }
 0x1eb   : >> { %1286 = vmatprep.mubr.msk.bf16.mxu0 %vm457_vm0, %v775_v40  ;;  %v741_v44 = vadd.f32 %v1624_v13, %v740_v43  ;;  %v1275_v45 = vpop.f32.mrb[14].mxu1 }
 0x1ec   : >> { %1287 = vmatmul.mubr.msk.bf16.gmra.mrb[24].mxu0 %vm457_vm0, %v776_v39  ;;  %v769_v46 = vmax.f32 %v749_v42, 0.0  ;;  %v752_v47 = vadd.f32 %v1275_v45, %v1624_v13  ;;  %v743_v48 = vpop.f32.mrb[15].mxu1 }
 0x1ed   : >> { %v767_v49 = vmax.f32 %v741_v44, 0.0  ;;  %v744_v50 = vadd.f32 %v1624_v13, %v743_v48 }
 0x1ee   : >> { %v770_v51 = vmax.f32 %v752_v47, 0.0 }
 0x1ef   : >> { %v768_v52 = vmax.f32 %v744_v50, 0.0 }
 0x1f0   : >> { %v778_v53 = vpack.c.bf16 %v770_v51, %v769_v46 }
 0x1f1   : >> { %v777_v54 = vpack.c.bf16 %v768_v52, %v767_v49 }
 0x1f3   : >> { %1290 = vmatprep.mubr.msk.bf16.mxu0 %vm457_vm0, %v777_v54 }
 0x1f4   : >> { %1291 = vmatmul.mubr.msk.bf16.gmra.mrb[28].mxu0 %vm457_vm0, %v778_v53 }
 0x2af   : >> { %v1280_v57 = vpop.f32.mrb[16].mxu0 }
 0x2b0   : >> { %v858_v58 = vadd.f32 %v1280_v57, %v1644_v16  ;;  %v849_v59 = vpop.f32.mrb[17].mxu0 }
 0x2b1   : >> { %v850_v60 = vadd.f32 %v1644_v16, %v849_v59  ;;  %v1281_v61 = vpop.f32.mrb[18].mxu0 }
 0x2b2   : >> { %v861_v62 = vadd.f32 %v1281_v61, %v1644_v16  ;;  %v852_v63 = vpop.f32.mrb[19].mxu0  ;;  %v914_v20 = vmax.f32 %v858_v58, 0.0 }
 0x2b3   : >> { %v853_v19 = vadd.f32 %v1644_v16, %v852_v63  ;;  %v912_v22 = vmax.f32 %v850_v60, 0.0 }
 0x2b4   : >> { %v915_v21 = vmax.f32 %v861_v62, 0.0 }
 0x2b5   : >> { %v913_v23 = vmax.f32 %v853_v19, 0.0 }
 0x2b6   : >> { %v929_v24 = vpack.c.bf16 %v915_v21, %v914_v20 }
 0x2b7   : >> { %v928_v25 = vpack.c.bf16 %v913_v23, %v912_v22  ;;  %v1284_v26 = vpop.f32.mrb[20].mxu0 }
 0x2b8   : >> { %v874_v27 = vadd.f32 %v1284_v26, %v1644_v16  ;;  %v865_v28 = vpop.f32.mrb[21].mxu0  ;;  %v958_v44 = vsel %vm457_vm0, %v929_v24, 0 }
 0x2b9   : >> { %v866_v29 = vadd.f32 %v1644_v16, %v865_v28  ;;  %v1285_v30 = vpop.f32.mrb[22].mxu0  ;;  %v955_v31 = vsel %vm457_vm0, %v928_v25, 0 }
 0x2ba   : >> { %v877_v32 = vadd.f32 %v1285_v30, %v1644_v16  ;;  %v868_v33 = vpop.f32.mrb[23].mxu0  ;;  %1295 = vmatpush3.bf16.xpose.msra.mxu1 %v955_v31  ;;  %v918_v35 = vmax.f32 %v874_v27, 0.0 }
 0x2bb   : >> { %v869_v34 = vadd.f32 %v1644_v16, %v868_v33  ;;  %1296 = vmatprep.subr.bf16.mxu1 %v1446_v55  ;;  %v916_v37 = vmax.f32 %v866_v29, 0.0  ;;  %v939_v33 = vpop.permute.xlu0 %938 }
 0x2bc   : >> { %v919_v36 = vmax.f32 %v877_v32, 0.0  ;;  %v1175_v32 = vcombine.low %v1649_v17, %v1654_v18 }
 0x2bd   : >> { %v917_v38 = vmax.f32 %v869_v34, 0.0 }
 0x2be   : >> { %v931_v39 = vpack.c.bf16 %v919_v36, %v918_v35 }
 0x2bf   : >> { %v930_v40 = vpack.c.bf16 %v917_v38, %v916_v37  ;;  %v1288_v41 = vpop.f32.mrb[24].mxu0  ;;  %v944_v37 = vpop.permute.xlu0 %943 }
 0x2c0   : >> { %v890_v42 = vadd.f32 %v1288_v41, %v1644_v16  ;;  %v881_v43 = vpop.f32.mrb[25].mxu0  ;;  %v964_v27 = vsel %vm457_vm0, %v931_v39, 0 }
 0x2c1   : >> { %v882_v45 = vadd.f32 %v1644_v16, %v881_v43  ;;  %v1289_v46 = vpop.f32.mrb[26].mxu0  ;;  %v961_v60 = vsel %vm457_vm0, %v930_v40, 0 }
 0x2c2   : >> { %1297 = vmatpush3.bf16.xpose.msra.mxu1 %v958_v44  ;;  %v922_v47 = vmax.f32 %v890_v42, 0.0  ;;  %v893_v48 = vadd.f32 %v1289_v46, %v1644_v16  ;;  %v884_v49 = vpop.f32.mrb[27].mxu0 }
 0x2c3   : >> { %v920_v50 = vmax.f32 %v882_v45, 0.0  ;;  %v885_v51 = vadd.f32 %v1644_v16, %v884_v49  ;;  %1298 = vmatprep.subr.bf16.mxu1 %v1446_v55 }
 0x2c4   : >> { %v923_v52 = vmax.f32 %v893_v48, 0.0 }
 0x2c5   : >> { %v921_v53 = vmax.f32 %v885_v51, 0.0 }
 0x2c6   : >> { %v933_v54 = vpack.c.bf16 %v923_v52, %v922_v47 }
 0x2c7   : >> { %v932_v56 = vpack.c.bf16 %v921_v53, %v920_v50  ;;  %v1292_v57 = vpop.f32.mrb[28].mxu0 }
 0x2c8   : >> { %v906_v58 = vadd.f32 %v1292_v57, %v1644_v16  ;;  %v897_v59 = vpop.f32.mrb[29].mxu0  ;;  %v970_v29 = vsel %vm457_vm0, %v933_v54, 0 }
 0x2c9   : >> { %v898_v61 = vadd.f32 %v1644_v16, %v897_v59  ;;  %v1293_v62 = vpop.f32.mrb[30].mxu0  ;;  %v967_v28 = vsel %vm457_vm0, %v932_v56, 0 }
 0x2ca   : >> { %1299 = vmatpush3.bf16.xpose.msra.mxu1 %v961_v60  ;;  %v926_v63 = vmax.f32 %v906_v58, 0.0  ;;  %v909_v19 = vadd.f32 %v1293_v62, %v1644_v16  ;;  %v900_v20 = vpop.f32.mrb[31].mxu0 }
 0x2cb   : >> { %1300 = vmatprep.subr.bf16.mxu1 %v1446_v55  ;;  %v924_v21 = vmax.f32 %v898_v61, 0.0  ;;  %v901_v22 = vadd.f32 %v1644_v16, %v900_v20 }
 0x2cc   : >> { %v927_v23 = vmax.f32 %v909_v19, 0.0 }
 0x2cd   : >> { %v925_v24 = vmax.f32 %v901_v22, 0.0 }
 0x2ce   : >> { %v935_v25 = vpack.c.bf16 %v927_v23, %v926_v63 }
 0x2cf   : >> { %v934_v26 = vpack.c.bf16 %v925_v24, %v924_v21 }
 0x2d0   : >> { %v976_v31 = vsel %vm457_vm0, %v935_v25, 0 }
 0x2d1   : >> { %v973_v30 = vsel %vm457_vm0, %v934_v26, 0 }
 0x2d2   : >> { %1301 = vmatpush3.bf16.xpose.msra.mxu1 %v964_v27 }
 0x2d3   : >> { %1302 = vmatprep.subr.bf16.mxu1 %v1446_v55 }
 0x2da   : >> { %1303 = vmatpush3.bf16.xpose.msra.mxu1 %v967_v28 }
 0x2db   : >> { %1304 = vmatprep.subr.bf16.mxu1 %v1446_v55 }
 0x2e2   : >> { %1305 = vmatpush3.bf16.xpose.msra.mxu1 %v970_v29 }
 0x2e3   : >> { %1306 = vmatprep.subr.bf16.mxu1 %v1446_v55 }
 0x2ea   : >> { %1307 = vmatpush3.bf16.xpose.msra.mxu1 %v973_v30 }
 0x2eb   : >> { %1308 = vmatprep.subr.bf16.mxu1 %v1446_v55 }
 0x2f2   : >> { %1309 = vmatpush3.bf16.xpose.msra.mxu1 %v976_v31 }
 0x2f9   : >> { %1311 = vmatmul.mubr.msk.bf16.vlgmr.msra.gmra.mrb[16].mxu1 %vm457_vm0, %v1175_v32 }
 0x3cc   : >> { %v1012_v34 = vpop.f32.mrb[16].mxu1 }
 0x3cd   : >> { %v1013_v35 = vadd.f32 %v1012_v34, %v939_v33  ;;  %v1312_v36 = vpop.f32.mrb[17].mxu1  ;;  %382 = sbr.rel (!%p380_p11) target bundleno = 26 (0x1a), region = 100 }
 0x3ce   : >> { %v1015_v38 = vpop.f32.mrb[18].mxu1 }
 0x3cf   : >> { %v1190_v55 = vpack.c.bf16 %v1013_v35, %v1013_v35  ;;  %v1016_v39 = vadd.f32 %v1015_v38, %v944_v37  ;;  %v1313_v40 = vpop.f32.mrb[19].mxu1 }
 0x3d1   : >> { %1031 = vst [vmem:[%s1030_s17] sm:$0xf] %v1190_v55  ;;  %v1191_v41 = vpack.c.bf16 %v1016_v39, %v1016_v39 }
 0x3d3   : >> { %1032 = vst [vmem:[%s1030_s17 + $0x10] sm:$0xf] %v1191_v41 }
 0x3d4   : > { %1040 = sbr.rel (!%p1540_p5) target bundleno = 1016 (0x3f8), region = 67  ;;  %s1181_s1 = sshll.u32 (%p1540_p5), %s1523_s13, 2 }
 0x3d5   : > { %s1042_s25 = ssub.s32 (%p1540_p5), 6, %s1181_s1 }
 0x3d6   : > { %p1043_p12 = scmp.lt.s32.totalorder (%p1540_p5), %s1042_s25, 4 }
 0x3db   : > { %s1872_s25 = smov (!%p1043_p12, %s1042_s25), 4 }
 0x3dc   : > { %s1789_s28 = sshll.u32 %s1872_s25, 7 }
 0x3dd   : > { %s1047_s24 = ssub.s32 512, %s1789_s28 }
 0x3de   : > { %1048 = vsyncadd %s1781_s21, %s1047_s24  ;;  %p1183_p13 = scmp.ne.s32.totalorder %s1789_s28, 0  ;;  %s1192_s19 = sshll.u32 %s1523_s13, 8 }
 0x3df   : > { %s1798_s29 = scalar_lea.hbm %s1858_s9, %s1192_s19  ;;  %s1185_s16 = sshll.u32 %s1872_s25, 2 }
 0x3e0   : > { %s1054_s17 = sshll.u32 %s338_s14, 4  ;;  %s1449_s1 = smov [#allocation2]   ;;  %s1803_s17 = int_to_ptr.vmem [resolvable:$true] %s1054_s17 }
 0x3e1   : > { %s1374_s23 = scalar_lea.vmem %s1803_s17, %s1789_s28  ;;  %s1378_s13 = sshll.u32 %s1449_s1, 4  ;;  %s1379_s13 = int_to_ptr.vmem [resolvable:$false] %s1378_s13 }
 0x3e2   : > { %p1375_p0 = scmp.ne.s32.totalorder %s1803_s17, %s1374_s23  ;;  %s1380_s24 = scalar_lea.vmem %s1379_s13, 1024 }
 0x3e3   : > { %p1381_p3 = scmp.lt.s32.totalorder %s1803_s17, %s1379_s13  ;;  %p1382_p4 = scmp.lt.s32.totalorder %s1380_s24, %s1374_s23 }
 0x3e4   : > { %p1376_p1 = pnand %p1375_p0, %p1183_p13 }
 0x3e5   : > { %p1383_p5 = por %p1382_p4, %p1381_p3 }
 0x3e6   : > { %p1377_p2 = pneg %p1376_p1 }
 0x3e8   : > { %p1384_p7 = pnand %p1383_p5, %p1377_p2 }
 0x3ea   : > { %1387 = shalt.err (!%p1384_p7)
}
 0x3eb   : > { %s1388_s27 = scalar_lea.hbm %s1798_s29, %s1789_s28  ;;  %s1392_s26 = scalar_lea.hbm %s1858_s9, 768 }
 0x3ec   : > { %p1389_p8 = scmp.ne.s32.totalorder %s1798_s29, %s1388_s27  ;;  %p1393_p11 = scmp.lt.u32.totalorder %s1798_s29, %s1858_s9 }
 0x3ed   : > { %p1394_p12 = scmp.lt.u32.totalorder %s1392_s26, %s1388_s27  ;;  %p1396_p1 = scmp.lt.u32.totalorder %s1388_s27, %s1798_s29 }
 0x3ee   : > { %p1390_p9 = pnand %p1389_p8, %p1183_p13 }
 0x3ef   : > { %p1395_p0 = por %p1394_p12, %p1393_p11 }
 0x3f0   : > { %p1391_p10 = pneg %p1390_p9 }
 0x3f1   : > { %p1397_p2 = por %p1396_p1, %p1395_p0 }
 0x3f3   : > { %p1398_p3 = pnand %p1397_p2, %p1391_p10 }
 0x3f5   : > { %1401 = shalt.err (!%p1398_p3)
}
 0x3f6   : > { %s1450_s1 = smov 256   ;;  %s1451_s13 = smov 384  }
 0x3f7   : > { %1060 = dma.vmem_to_hbm [thread:$0]  (%p1183_p13), %s1803_s17, %s1789_s28, %s1798_s29, %s1781_s21, %s1450_s1, %s1451_s13, %s1185_s16  }
 0x3f8 PF: > { %p1319_p4 = scmp.ge.s32.totalorder %s1440_s12, 2  ;;  %s1069_s24 = sand.u32 1, %s1428_s30  }
 0x3f9   : > { %s1070_s27 = scalar_lea.sflag [#allocation3], %s1069_s24 }
 0x3fa   : > { %p1316_p5 = pnand %p1319_p4, %p1544_p6 }
 0x3fc   : > { %1423 = dma.done.wait (!%p1316_p5), %s1070_s27, 512  }
 0x3fd   : > { %1425 = vsyncadd (!%p1316_p5), %s1070_s27, 4294966784  ;;  %p19_p7 = scmp.ge.s32.totalorder %s1527_s15, 4   ;;  %s1865_s30 = smov %s1432_s10 }
 0x3fe   : > { %s1866_s10 = smov %s1436_s11  ;;  %s1867_s11 = smov %s1538_s18 }
 0x3ff   : > { %s1868_s12 = smov %s1527_s15  ;;  %21 = sbr.rel (!%p19_p7) target bundleno = 5 (0x5), region = 111 }
 0x406   :  { %1075 = vsyncpa [#allocation3], 1 }
 0x407   :  { %1077 = vsyncpa [#allocation3 + $0x1], 1 }

</bundles_post_ra>
